<compile_context>
chip_gen: v7x
topology: tpu7x:2x2x1
jax: 0.10.0
libtpu: 0.0.40
codegen_flags: <defaults>
</compile_context>

<pallas_src>
import functools

import jax
import jax.numpy as jnp
from jax.experimental import pallas as pl
from jax.experimental.pallas import tpu as pltpu


def _resident_spec(shape):
    """Constant-index BlockSpec; single-buffered when pipeline_mode is supported."""
    index_map = lambda i: (0,) * len(shape)
    try:
        return pl.BlockSpec(shape, index_map, pipeline_mode=pl.Buffered(1))
    except TypeError:  # older BlockSpec without pipeline_mode kwarg
        return pl.BlockSpec(shape, index_map)


def _make_kernel(bb):
    def kernel(x_ref, w_ref, add_ref, out_ref):
        # x_ref:   (BB, S, K) bf16  flattened patches; row 0 of each image is a zero cls slot
        # w_ref:   (K, D)     bf16  patch-projection matrix (conv weight), resident
        # add_ref: (S, D)     f32   row 0: cls + pos[0]; rows 1..Np: conv bias + pos[i]; resident
        # out_ref: (BB, S, D) f32
        w = w_ref[...]
        add = add_ref[...]
        for b in range(bb):  # static unroll: bb independent MXU matmuls, f32 accumulation
            y = jnp.dot(x_ref[b], w, preferred_element_type=jnp.float32)
            out_ref[b] = (y + add).astype(out_ref.dtype)
    return kernel


@functools.partial(jax.jit, static_argnames=("patch_size",))
def image_embedding(x, conv_w, conv_b, cls_token, pos_table, patch_size):
    """x: (B, 3, H, W) f32 NCHW. Returns (B, 1 + (H//P)*(W//P), D) f32, matching PyTorch."""
    B, C, H, W = x.shape
    P = patch_size
    hp, wp = H // P, W // P
    Np = hp * wp
    D = conv_w.shape[0]
    K = C * P * P
    S = Np + 1
    assert pos_table.shape[0] >= S, "position_embedding_table smaller than sequence length"

    # ---- im2col (non-overlapping patches); cast bf16 first so the transpose moves half bytes ----
    xb = x[:, :, : hp * P, : wp * P].astype(jnp.bfloat16)
    xp = xb.reshape(B, C, hp, P, wp, P)
    xp = jnp.transpose(xp, (0, 2, 4, 1, 3, 5)).reshape(B, Np, K)   # (c, ph, pw) matches OIHW

    # ---- tile sizing: ~2048 matmul rows / step under an explicit VMEM budget ----
    TARGET_ROWS = 2048
    VMEM_BUDGET = 40 << 20                              # pipeline buffers; limit below set to 48 MiB
    resident = K * D * 2 + S * D * 4                    # weight (bf16) + addend (f32), single-buffered
    per_image = 2 * S * K * 2 + 2 * S * D * 4           # x (bf16) + out (f32), double-buffered
    bb = max(1, min(B,
                    max(1, TARGET_ROWS // S),
                    max(1, (VMEM_BUDGET - resident) // per_image)))
    min_steps = min(4, B)                               # keep >= 4 grid steps for v7x's two TCs
    bb = min(bb, max(1, -(-B // min_steps)))
    n_steps = -(-B // bb)
    B_pad = n_steps * bb                                # pad ragged batches instead of shrinking bb

    # Prepend one zero "cls slot" row per image; zero-pad the batch (pad images sliced off below).
    xmat = jnp.pad(xp, ((0, B_pad - B), (1, 0), (0, 0)))            # (B_pad, S, K) bf16

    # Resident projection matrix and per-row additive term.
    w_mat = conv_w.reshape(D, K).T.astype(jnp.bfloat16)             # (K, D) bf16
    addend = jnp.concatenate(
        [cls_token.reshape(1, D) + pos_table[:1],                   # row 0: cls + pos[0]
         conv_b.reshape(1, D) + pos_table[1:S]], axis=0)            # rows 1..Np: bias + pos[i]
    addend = addend.astype(jnp.float32)                             # f32 epilogue (v5e-friendly)

    out = pl.pallas_call(
        _make_kernel(bb),
        out_shape=jax.ShapeDtypeStruct((B_pad, S, D), jnp.float32),
        grid_spec=pltpu.PrefetchScalarGridSpec(
            num_scalar_prefetch=0,
            grid=(n_steps,),
            in_specs=[
                pl.BlockSpec((bb, S, K), lambda i: (i, 0, 0)),      # streamed patch blocks
                _resident_spec((K, D)),                             # weight, resident, 1-buffered
                _resident_spec((S, D)),                             # addend, resident, 1-buffered
            ],
            out_specs=pl.BlockSpec((bb, S, D), lambda i: (i, 0, 0)),
        ),
        compiler_params=pltpu.CompilerParams(
            dimension_semantics=("parallel",),
            vmem_limit_bytes=48 * 1024 * 1024,   # > v5e 16 MiB default, < v7x 64 MiB physical
        ),
    )(xmat, w_mat, addend)

    # No S/D crop; only a cheap batch-dim slice, and only when the batch had to be padded.
    return out if B_pad == B else out[:B]


def _reference(x, conv_w, conv_b, cls_token, pos_table, patch_size):
    """Pure-JAX f32 reference mirroring the PyTorch forward exactly."""
    pe = jax.lax.conv_general_dilated(
        x, conv_w, window_strides=(patch_size, patch_size), padding="VALID",
        dimension_numbers=("NCHW", "OIHW", "NCHW"))
    pe = pe + conv_b.reshape(1, -1, 1, 1)
    bs, oc, h, w = pe.shape
    pe = pe.reshape(bs, oc, h * w)
    pe = jnp.swapaxes(pe, -1, -2)                                   # (bs, h*w, D)
    cls = jnp.tile(cls_token, (bs, 1, 1))                           # (bs, 1, D)
    tok = jnp.concatenate([cls, pe], axis=1)
    seq_len = tok.shape[1]
    return tok + pos_table[:seq_len][None]


if __name__ == "__main__":
    patch_size = 4
    model_dim = 32
    max_token = 64
    B, C, H, W = 2, 3, 16, 16

    key = jax.random.PRNGKey(0)
    k1, k2, k3, k4, k5 = jax.random.split(key, 5)
    x = jax.random.normal(k1, (B, C, H, W), dtype=jnp.float32)
    conv_w = jax.random.normal(k2, (model_dim, C, patch_size, patch_size), dtype=jnp.float32) * 0.05
    conv_b = jax.random.normal(k3, (model_dim,), dtype=jnp.float32) * 0.05
    cls_token = jax.random.normal(k4, (1, 1, model_dim), dtype=jnp.float32)
    pos_table = jax.random.normal(k5, (max_token, model_dim), dtype=jnp.float32)

    out = image_embedding(x, conv_w, conv_b, cls_token, pos_table, patch_size)
    out = jax.block_until_ready(out)

    ref = _reference(x, conv_w, conv_b, cls_token, pos_table, patch_size)
    assert out.shape == ref.shape, (out.shape, ref.shape)
    max_err = float(jnp.max(jnp.abs(out - ref)))
    # bf16 patch projection vs f32 conv reference: loosened tolerance.
    assert jnp.allclose(out, ref, atol=2e-2, rtol=2e-2), max_err
    print("KERNEL_OK")
</pallas_src>

<mosaic_0001>
module attributes {stable_mosaic.version = 11 : i64} {
  func.func @kernel(%arg0: i32, %arg1: memref<1x17x48xbf16, #tpu.memory_space<vmem>>, %arg2: memref<48x32xbf16, #tpu.memory_space<vmem>>, %arg3: memref<17x32xf32, #tpu.memory_space<vmem>>, %arg4: memref<1x17x32xf32, #tpu.memory_space<vmem>>) attributes {dimension_semantics = [#tpu.dimension_semantics<parallel>], iteration_bounds = array<i64: 2>, scalar_prefetch = 0 : i64, scratch_operands = 0 : i64, tpu.core_type = #tpu.core_type<tc>, window_params = [{transform_indices = @transform_0, window_bounds = array<i64: 1, 17, 48>}, {pipeline_mode = #tpu.pipeline_mode<synchronous>, transform_indices = @transform_1, window_bounds = array<i64: 48, 32>}, {pipeline_mode = #tpu.pipeline_mode<synchronous>, transform_indices = @transform_2, window_bounds = array<i64: 17, 32>}, {transform_indices = @transform_3, window_bounds = array<i64: 1, 17, 32>}]} {
    %c0 = arith.constant 0 : index
    %c0_0 = arith.constant 0 : index
    %0 = vector.load %arg2[%c0, %c0_0] : memref<48x32xbf16, #tpu.memory_space<vmem>>, vector<48x32xbf16>
    %c0_1 = arith.constant 0 : index
    %c0_2 = arith.constant 0 : index
    %1 = vector.load %arg3[%c0_1, %c0_2] : memref<17x32xf32, #tpu.memory_space<vmem>>, vector<17x32xf32>
    %c0_3 = arith.constant 0 : index
    %c0_4 = arith.constant 0 : index
    %c0_5 = arith.constant 0 : index
    %2 = vector.load %arg1[%c0_3, %c0_4, %c0_5] : memref<1x17x48xbf16, #tpu.memory_space<vmem>>, vector<1x17x48xbf16>
    %3 = vector.shape_cast %2 : vector<1x17x48xbf16> to vector<17x48xbf16>
    %cst = arith.constant dense<0.000000e+00> : vector<17x32xf32>
    %4 = tpu.matmul %3, %0, %cst {dimension_numbers = #tpu.dot_dimension_numbers<[1], [0], [0], [1], [0, 0, 1, 1], [], []>} : vector<17x48xbf16>, vector<48x32xbf16>, vector<17x32xf32> -> vector<17x32xf32>
    %5 = arith.addf %4, %1 : vector<17x32xf32>
    %c0_6 = arith.constant 0 : index
    %c0_7 = arith.constant 0 : index
    %c0_8 = arith.constant 0 : index
    %6 = vector.load %arg4[%c0_6, %c0_7, %c0_8] : memref<1x17x32xf32, #tpu.memory_space<vmem>>, vector<1x17x32xf32>
    %7 = vector.shape_cast %6 : vector<1x17x32xf32> to vector<17x32xf32>
    %8 = vector.shape_cast %5 : vector<17x32xf32> to vector<1x17x32xf32>
    tpu.vector_store %arg4[%c0_6, %c0_7, %c0_8], %8 {strides = array<i32>} : memref<1x17x32xf32, #tpu.memory_space<vmem>>, vector<1x17x32xf32>,
    return
  }
  func.func @transform_0(%arg0: i32) -> (i32, i32, i32) {
    %c0_i32 = arith.constant 0 : i32
    %c0_i32_0 = arith.constant 0 : i32
    %c0_i32_1 = arith.constant 0 : i32
    return %arg0, %c0_i32, %c0_i32_0 : i32, i32, i32
  }
  func.func @transform_1(%arg0: i32) -> (i32, i32) {
    %c0_i32 = arith.constant 0 : i32
    %c0_i32_0 = arith.constant 0 : i32
    %c0_i32_1 = arith.constant 0 : i32
    return %c0_i32, %c0_i32_0 : i32, i32
  }
  func.func @transform_2(%arg0: i32) -> (i32, i32) {
    %c0_i32 = arith.constant 0 : i32
    %c0_i32_0 = arith.constant 0 : i32
    %c0_i32_1 = arith.constant 0 : i32
    return %c0_i32, %c0_i32_0 : i32, i32
  }
  func.func @transform_3(%arg0: i32) -> (i32, i32, i32) {
    %c0_i32 = arith.constant 0 : i32
    %c0_i32_0 = arith.constant 0 : i32
    %c0_i32_1 = arith.constant 0 : i32
    return %arg0, %c0_i32, %c0_i32_0 : i32, i32, i32
  }
}

</mosaic_0001>

<bundles_post_ra>
// kernel: image_embedding.1
= control target key start
LH: loop header
LB: loop body
LE: loop exit
PB: predicated region body
PF: predicated region fallthrough
CT: control target
= control target key end

     0   :  { %s399_s12 = smov 0   ;;  %s434_s0 = inlined_call_operand.vmem [shape: bf16[2,17,48], index: 0, kind: input, shape index: {}]   ;;  %s435_s1 = inlined_call_operand.vmem [shape: bf16[48,32], index: 1, kind: input, shape index: {}]   ;;  %s436_s2 = inlined_call_operand.vmem [shape: f32[17,32], index: 2, kind: input, shape index: {}]   ;;  %s437_s3 = inlined_call_operand.vmem [shape: f32[2,17,32], index: 3, kind: output, shape index: {}]  }
   0x1 LB: > { %s325_s13 = sadd.s32 4294967295, %s377_s12   ;;  %p329_p0 = scmp.ge.s32.totalorder %s377_s12, 1  ;;  %s377_s12 = sphi %s399_s12, %s13_s12  }
   0x2   : > { %p137_p1 = scmp.lt.s32.totalorder %s377_s12, 3 }
   0x4   : > { %p138_p2 = pnand %p329_p0, %p137_p1 }
   0x5   : > { %v366_v0 = vld [vmem:[%s435_s1] sm:$0xff] (!%p138_p2)   ;;  %p161_p3 = scmp.lt.s32.totalorder (!%p138_p2), %s325_s13, 1  ;;  %v367_v1 = vld [vmem:[%s435_s1 + $0x8] sm:$0xff] (!%p138_p2)   ;;  %v368_v2 = vld [vmem:[%s435_s1 + $0x10] sm:$0xff] (!%p138_p2)   ;;  %vm210_vm0 = vcmask (!%p138_p2), 392192   ;;  %vm268_vm1 = vcmask (!%p138_p2), 253952  }
   0x6   : > { %141 = sbr.rel (%p138_p2) target bundleno = 237 (0xed), region = 32  ;;  %346 = vmatprep.subr.bf16.mxu0 (!%p138_p2), %v366_v0  ;;  %v180_v5 = vld [vmem:[%s436_s2 + $0x10] sm:$0x1] (!%p138_p2)  ;;  %v178_v6 = vld [vmem:[%s436_s2] sm:$0xff] (!%p138_p2)  ;;  %vm265_vm2 = vcmask (!%p138_p2), 261120   ;;  %v179_v10 = vld [vmem:[%s436_s2 + $0x8] sm:$0xff] (!%p138_p2) }
   0x7   : > { %347 = vmatpush3.bf16.msra.mxu0 (!%p138_p2), %v366_v0 }
   0x8   : > { %348 = vmatprep.subr.bf16.mxu0 (!%p138_p2), %v367_v1 }
   0xb   : > { %349 = vmatpush3.bf16.msra.mxu0 (!%p138_p2), %v367_v1 }
   0xc   : > { %350 = vmatprep.subr.bf16.mxu0 (!%p138_p2), %v368_v2 }
   0xd   : > { %s439_s13 = smov (!%p161_p3, %s325_s13), 1 }
   0xe   : > { %s356_s20 = smul.u32 12, %s439_s13 }
   0xf   : > { %351 = vmatpush3.bf16.msra.mxu0 %v368_v2  ;;  %s357_s24 = smul.u32 24, %s439_s13 }
  0x10   : > { %s165_s23 = scalar_lea.vmem %s434_s0, %s356_s20 }
  0x11   : > { %v369_v3 = vld [vmem:[%s165_s23] sm:$0xff]   ;;  %v370_v4 = vld [vmem:[%s165_s23 + $0x8] ss:$0 sps:$4 sm:$0x11]   ;;  %s170_s4 = scalar_lea.vmem %s437_s3, %s357_s24 }
  0x12   : > { %352 = vmatprep.mubr.msk.bf16.mxu0 %vm210_vm0, %v369_v3 }
  0x13   : > { %353 = vmatmul.mubr.msk.bf16.vlgmr.msra.gmra.mrb[0].mxu0 %vm210_vm0, %v370_v4 }
  0xe6   : > { %v354_v7 = vpop.f32.mrb[0].mxu0 }
  0xe7   : > { %v260_v8 = vadd.f32 %v354_v7, %v180_v5  ;;  %v251_v9 = vpop.f32.mrb[1].mxu0 }
  0xe8   : > { %v252_v11 = vadd.f32 %v251_v9, %v178_v6  ;;  %v355_v12 = vpop.f32.mrb[2].mxu0 }
  0xe9   : > { %269 = vst.msk [vmem:[%s170_s4 + $0x10] sm:$0x1] %vm268_vm1, %v260_v8  ;;  %v254_v13 = vpop.f32.mrb[3].mxu0 }
  0xea   : > { %266 = vst.msk [vmem:[%s170_s4] sm:$0xff] %vm265_vm2, %v252_v11  ;;  %v255_v14 = vadd.f32 %v254_v13, %v179_v10 }
  0xec   : > { %267 = vst.msk [vmem:[%s170_s4 + $0x8] sm:$0xff] %vm265_vm2, %v255_v14 }
  0xed PF: > { %s13_s12 = sadd.s32 1, %s377_s12  }
  0xee   : > { %p10_p4 = scmp.ge.s32.totalorder %s13_s12, 4  }
  0xf0   :  { %12 = sbr.rel (!%p10_p4) target bundleno = 1 (0x1), region = 62 }

</bundles_post_ra>
